<compile_context>
chip_gen: v5e
topology: v5e:2x2
jax: 0.10.0
libtpu: 0.0.40
codegen_flags: <defaults>
</compile_context>

<pallas_src>
import functools
import math

import jax
import jax.numpy as jnp
from jax.experimental import pallas as pl
from jax.experimental.pallas import tpu as pltpu

C = 7        # channel count fixed by the module
K = 5        # kernel size
DIL2 = 5     # dilation of the second conv
PAD1 = 4     # causal left context of conv1 (dil=1), in x samples
PAD2 = 20    # causal left context of conv2 (dil=5), in x1 samples
HALO = PAD1 + PAD2   # = 24 lanes of x left context needed per time tile
CTX = 128    # halo block width (aligned 128-lane slab)


def _kernel(x_ref, halo_ref, w1_ref, w2_ref, w3_ref,
            b1_ref, b2_ref, b3_ref, o_ref, *, t_tile):
    t_idx = pl.program_id(1)
    f32 = jnp.float32

    x_tile = x_ref[0].astype(f32)                      # (C, t_tile)

    # Previous tile's last 128 lanes of x; at the start of a sequence the
    # halo block index is clamped to tile 0, so zero it (causal zero pad).
    # (Select, not multiply, so stale/garbage lanes can never produce NaN.)
    halo = jnp.where(t_idx > 0, halo_ref[0].astype(f32), 0.0)   # (C, CTX)

    # Contiguous window x[t0 - CTX, t0 + t_tile): aligned lane concat.
    xext = jnp.concatenate([halo, x_tile], axis=-1)    # (C, CTX + t_tile)

    l1 = t_tile + PAD2          # y1 window: tile + 20 lanes of x1 left ctx
    base = CTX - HALO           # = 104: first xext lane conv1 tap 0 touches

    # conv_dilated1 (causal, k=5, dil=1) as ONE stacked dot:
    # im2col (K*C=35, l1) of the 5 shifted slices x pre-stacked (C, K*C).
    x1col = jnp.concatenate(
        [xext[:, base + k: base + k + l1] for k in range(K)], axis=0)
    y1 = jnp.dot(w1_ref[...], x1col, preferred_element_type=f32) + b1_ref[...]

    # Reference zero-pads conv1's OUTPUT as conv2's left context: y1 lanes
    # whose global x1 index (t0 - 20 + i) is negative must be exactly 0
    # (only possible on the first time tile of a sequence).
    pos = jax.lax.broadcasted_iota(jnp.int32, (C, l1), 1) + t_idx * t_tile
    y1 = jnp.where(pos >= PAD2, y1, 0.0)

    # conv_dilated2 (causal, k=5, dil=5) as one stacked dot, then ReLU.
    x2col = jnp.concatenate(
        [y1[:, DIL2 * k: DIL2 * k + t_tile] for k in range(K)], axis=0)
    y2 = jnp.dot(w2_ref[...], x2col, preferred_element_type=f32) + b2_ref[...]
    y2 = jnp.maximum(y2, 0.0)

    # conv_1x1 + residual.
    # TODO(synk): nn.Dropout is identity in eval mode; training-mode random
    # masking (torch RNG) is not reproduced here.
    out = jnp.dot(w3_ref[...], y2, preferred_element_type=f32) + b3_ref[...]
    o_ref[0] = (x_tile + out).astype(o_ref.dtype)


def dilated_smooth_layer(x, w1, b1, w2, b2, w3, b3, *, t_tile=1024):
    """x: (N, 7, T); w1, w2: (7, 7, 5); w3: (7, 7, 1); b*: (7,)."""
    N, Cx, T = x.shape
    assert Cx == C

    # Lane-dense 128-multiple time tiles, not exceeding (rounded-up) T.
    t128 = pl.cdiv(T, 128) * 128
    t_tile = max(128, (min(t_tile, t128) // 128) * 128)
    n_t = pl.cdiv(T, t_tile)          # ragged T -> partial last block
    nblk = t_tile // 128              # halo block-index stride

    f32 = jnp.float32
    # Pre-stacked conv weights: (Cout, K*Cin); column block [7k, 7k+7) = tap k.
    w1s = jnp.transpose(w1.astype(f32), (0, 2, 1)).reshape(C, K * C)
    w2s = jnp.transpose(w2.astype(f32), (0, 2, 1)).reshape(C, K * C)
    w3m = w3[:, :, 0].astype(f32)                     # (Cout, Cin)
    b1c = b1.astype(f32)[:, None]                     # (C, 1)
    b2c = b2.astype(f32)[:, None]
    b3c = b3.astype(f32)[:, None]

    kernel = functools.partial(_kernel, t_tile=t_tile)
    return pl.pallas_call(
        kernel,
        out_shape=jax.ShapeDtypeStruct((N, C, T), x.dtype),
        grid=(N, n_t),
        in_specs=[
            # Current time tile of x.
            pl.BlockSpec((1, C, t_tile), lambda n, t: (n, 0, t)),
            # Halo: previous tile's last 128 lanes (clamped to tile 0; the
            # kernel zeroes it when t == 0).  Same array x, second operand.
            pl.BlockSpec((1, C, CTX),
                         lambda n, t: (n, 0, jnp.maximum(t * nblk - 1, 0))),
            pl.BlockSpec((C, K * C), lambda n, t: (0, 0)),   # w1 stacked
            pl.BlockSpec((C, K * C), lambda n, t: (0, 0)),   # w2 stacked
            pl.BlockSpec((C, C), lambda n, t: (0, 0)),       # w3 (1x1)
            pl.BlockSpec((C, 1), lambda n, t: (0, 0)),       # b1
            pl.BlockSpec((C, 1), lambda n, t: (0, 0)),       # b2
            pl.BlockSpec((C, 1), lambda n, t: (0, 0)),       # b3
        ],
        out_specs=pl.BlockSpec((1, C, t_tile), lambda n, t: (n, 0, t)),
        compiler_params=pltpu.CompilerParams(
            dimension_semantics=("parallel", "parallel")),
    )(x, x, w1s, w2s, w3m, b1c, b2c, b3c)


# -------------------- pure-JAX reference (PyTorch semantics) ----------------
def _ref_forward(x, w1, b1, w2, b2, w3, b3):
    def conv1d(inp, w, b, pad, dil):
        n, ci, t = inp.shape
        co, _, k = w.shape
        xp = jnp.pad(inp, ((0, 0), (0, 0), (pad, pad)))
        tout = t + 2 * pad - dil * (k - 1)
        out = jnp.zeros((n, co, tout), jnp.float32)
        for kk in range(k):
            out = out + jnp.einsum('oc,nct->not', w[:, :, kk],
                                   xp[:, :, kk * dil:kk * dil + tout])
        return out + b[None, :, None]

    x1 = conv1d(x, w1, b1, PAD1, 1)
    x1 = conv1d(x1[:, :, :-4], w2, b2, PAD2, DIL2)
    out = jnp.maximum(x1, 0.0)
    out = out[:, :, :-PAD2]
    out = conv1d(out, w3, b3, 0, 1)
    return x + out


if __name__ == "__main__":
    key = jax.random.PRNGKey(0)
    ks = jax.random.split(key, 7)
    # Small shapes: 2 sequences, 7 channels (fixed by the module), T=333
    # (ragged -> exercises the partial last block; with t_tile=128 there are
    # 3 time tiles -> exercises the halo re-read and first-tile masking).
    N, T = 2, 333
    x = jax.random.normal(ks[0], (N, C, T), jnp.float32)

    # Deterministic synthetic params (PyTorch Conv1d default uniform bounds).
    bnd = 1.0 / math.sqrt(C * K)
    w1 = jax.random.uniform(ks[1], (C, C, K), jnp.float32, -bnd, bnd)
    b1 = jax.random.uniform(ks[2], (C,), jnp.float32, -bnd, bnd)
    w2 = jax.random.uniform(ks[3], (C, C, K), jnp.float32, -bnd, bnd)
    b2 = jax.random.uniform(ks[4], (C,), jnp.float32, -bnd, bnd)
    bnd1x1 = 1.0 / math.sqrt(C)
    w3 = jax.random.uniform(ks[5], (C, C, 1), jnp.float32, -bnd1x1, bnd1x1)
    b3 = jax.random.uniform(ks[6], (C,), jnp.float32, -bnd1x1, bnd1x1)

    ref = _ref_forward(x, w1, b1, w2, b2, w3, b3)

    # Small tile: multiple time tiles (halo carry path) + ragged last block.
    out_small = jax.block_until_ready(
        dilated_smooth_layer(x, w1, b1, w2, b2, w3, b3, t_tile=128))
    # Default (large) tile: single partial block per sequence.
    out_big = jax.block_until_ready(
        dilated_smooth_layer(x, w1, b1, w2, b2, w3, b3))

    for out in (out_small, out_big):
        assert out.shape == x.shape, (out.shape, x.shape)
        max_err = float(jnp.max(jnp.abs(out - ref)))
        assert jnp.allclose(out, ref, atol=1e-3, rtol=1e-3), max_err
    print("KERNEL_OK")
</pallas_src>

<mosaic_0001>
module attributes {stable_mosaic.version = 11 : i64} {
  func.func @_kernel(%arg0: i32, %arg1: i32, %arg2: memref<1x7x128xf32, #tpu.memory_space<vmem>>, %arg3: memref<1x7x128xf32, #tpu.memory_space<vmem>>, %arg4: memref<7x35xf32, #tpu.memory_space<vmem>>, %arg5: memref<7x35xf32, #tpu.memory_space<vmem>>, %arg6: memref<7x7xf32, #tpu.memory_space<vmem>>, %arg7: memref<7x1xf32, #tpu.memory_space<vmem>>, %arg8: memref<7x1xf32, #tpu.memory_space<vmem>>, %arg9: memref<7x1xf32, #tpu.memory_space<vmem>>, %arg10: memref<1x7x128xf32, #tpu.memory_space<vmem>>) attributes {dimension_semantics = [#tpu.dimension_semantics<parallel>, #tpu.dimension_semantics<parallel>], iteration_bounds = array<i64: 2, 3>, scalar_prefetch = 0 : i64, scratch_operands = 0 : i64, tpu.core_type = #tpu.core_type<tc>, window_params = [{transform_indices = @transform_0, window_bounds = array<i64: 1, 7, 128>}, {transform_indices = @transform_1, window_bounds = array<i64: 1, 7, 128>}, {pipeline_mode = #tpu.pipeline_mode<synchronous>, transform_indices = @transform_2, window_bounds = array<i64: 7, 35>}, {pipeline_mode = #tpu.pipeline_mode<synchronous>, transform_indices = @transform_3, window_bounds = array<i64: 7, 35>}, {pipeline_mode = #tpu.pipeline_mode<synchronous>, transform_indices = @transform_4, window_bounds = array<i64: 7, 7>}, {pipeline_mode = #tpu.pipeline_mode<synchronous>, transform_indices = @transform_5, window_bounds = array<i64: 7, 1>}, {pipeline_mode = #tpu.pipeline_mode<synchronous>, transform_indices = @transform_6, window_bounds = array<i64: 7, 1>}, {pipeline_mode = #tpu.pipeline_mode<synchronous>, transform_indices = @transform_7, window_bounds = array<i64: 7, 1>}, {transform_indices = @transform_8, window_bounds = array<i64: 1, 7, 128>}]} {
    %c0 = arith.constant 0 : index
    %c0_0 = arith.constant 0 : index
    %c0_1 = arith.constant 0 : index
    %0 = vector.load %arg2[%c0, %c0_0, %c0_1] : memref<1x7x128xf32, #tpu.memory_space<vmem>>, vector<1x7x128xf32>
    %1 = vector.shape_cast %0 : vector<1x7x128xf32> to vector<7x128xf32>
    %c0_i32 = arith.constant 0 : i32
    %2 = arith.cmpi sgt, %arg1, %c0_i32 : i32
    %c0_2 = arith.constant 0 : index
    %c0_3 = arith.constant 0 : index
    %c0_4 = arith.constant 0 : index
    %3 = vector.load %arg3[%c0_2, %c0_3, %c0_4] : memref<1x7x128xf32, #tpu.memory_space<vmem>>, vector<1x7x128xf32>
    %4 = vector.shape_cast %3 : vector<1x7x128xf32> to vector<7x128xf32>
    %cst = arith.constant 0.000000e+00 : f32
    %5 = vector.broadcast %cst : f32 to vector<7x128xf32>
    %6 = arith.select %2, %4, %5 : vector<7x128xf32>
    %7 = tpu.concatenate %6, %1 in 1 : vector<7x128xf32>, vector<7x128xf32> -> vector<7x256xf32>
    %8 = vector.extract_strided_slice %7 {offsets = [0, 104], sizes = [7, 148], strides = [1, 1]} : vector<7x256xf32> to vector<7x148xf32>
    %9 = vector.extract_strided_slice %7 {offsets = [0, 105], sizes = [7, 148], strides = [1, 1]} : vector<7x256xf32> to vector<7x148xf32>
    %10 = vector.extract_strided_slice %7 {offsets = [0, 106], sizes = [7, 148], strides = [1, 1]} : vector<7x256xf32> to vector<7x148xf32>
    %11 = vector.extract_strided_slice %7 {offsets = [0, 107], sizes = [7, 148], strides = [1, 1]} : vector<7x256xf32> to vector<7x148xf32>
    %12 = vector.extract_strided_slice %7 {offsets = [0, 108], sizes = [7, 148], strides = [1, 1]} : vector<7x256xf32> to vector<7x148xf32>
    %13 = tpu.concatenate %8, %9, %10, %11, %12 in 0 : vector<7x148xf32>, vector<7x148xf32>, vector<7x148xf32>, vector<7x148xf32>, vector<7x148xf32> -> vector<35x148xf32>
    %c0_5 = arith.constant 0 : index
    %c0_6 = arith.constant 0 : index
    %14 = vector.load %arg4[%c0_5, %c0_6] : memref<7x35xf32, #tpu.memory_space<vmem>>, vector<7x35xf32>
    %cst_7 = arith.constant dense<0.000000e+00> : vector<7x148xf32>
    %15 = tpu.matmul %14, %13, %cst_7 {dimension_numbers = #tpu.dot_dimension_numbers<[1], [0], [0], [1], [0, 0, 1, 1], [], []>} : vector<7x35xf32>, vector<35x148xf32>, vector<7x148xf32> -> vector<7x148xf32>
    %c0_8 = arith.constant 0 : index
    %c0_9 = arith.constant 0 : index
    %16 = vector.load %arg7[%c0_8, %c0_9] : memref<7x1xf32, #tpu.memory_space<vmem>>, vector<7x1xf32>
    %17 = vector.broadcast %16 : vector<7x1xf32> to vector<7x148xf32>
    %18 = arith.addf %15, %17 : vector<7x148xf32>
    %19 = tpu.iota {dimensions = array<i32: 1>} : vector<7x148xi32>
    %c128_i32 = arith.constant 128 : i32
    %20 = arith.muli %arg1, %c128_i32 : i32
    %21 = vector.broadcast %20 : i32 to vector<7x148xi32>
    %22 = arith.addi %19, %21 : vector<7x148xi32>
    %c20_i32 = arith.constant 20 : i32
    %23 = vector.broadcast %c20_i32 : i32 to vector<7x148xi32>
    %24 = arith.cmpi sge, %22, %23 : vector<7x148xi32>
    %cst_10 = arith.constant 0.000000e+00 : f32
    %25 = vector.broadcast %cst_10 : f32 to vector<7x148xf32>
    %26 = arith.select %24, %18, %25 : vector<7x148xi1>, vector<7x148xf32>
    %27 = vector.extract_strided_slice %26 {offsets = [0, 0], sizes = [7, 128], strides = [1, 1]} : vector<7x148xf32> to vector<7x128xf32>
    %28 = vector.extract_strided_slice %26 {offsets = [0, 5], sizes = [7, 128], strides = [1, 1]} : vector<7x148xf32> to vector<7x128xf32>
    %29 = vector.extract_strided_slice %26 {offsets = [0, 10], sizes = [7, 128], strides = [1, 1]} : vector<7x148xf32> to vector<7x128xf32>
    %30 = vector.extract_strided_slice %26 {offsets = [0, 15], sizes = [7, 128], strides = [1, 1]} : vector<7x148xf32> to vector<7x128xf32>
    %31 = vector.extract_strided_slice %26 {offsets = [0, 20], sizes = [7, 128], strides = [1, 1]} : vector<7x148xf32> to vector<7x128xf32>
    %32 = tpu.concatenate %27, %28, %29, %30, %31 in 0 : vector<7x128xf32>, vector<7x128xf32>, vector<7x128xf32>, vector<7x128xf32>, vector<7x128xf32> -> vector<35x128xf32>
    %c0_11 = arith.constant 0 : index
    %c0_12 = arith.constant 0 : index
    %33 = vector.load %arg5[%c0_11, %c0_12] : memref<7x35xf32, #tpu.memory_space<vmem>>, vector<7x35xf32>
    %cst_13 = arith.constant dense<0.000000e+00> : vector<7x128xf32>
    %34 = tpu.matmul %33, %32, %cst_13 {dimension_numbers = #tpu.dot_dimension_numbers<[1], [0], [0], [1], [0, 0, 1, 1], [], []>} : vector<7x35xf32>, vector<35x128xf32>, vector<7x128xf32> -> vector<7x128xf32>
    %c0_14 = arith.constant 0 : index
    %c0_15 = arith.constant 0 : index
    %35 = vector.load %arg8[%c0_14, %c0_15] : memref<7x1xf32, #tpu.memory_space<vmem>>, vector<7x1xf32>
    %36 = vector.broadcast %35 : vector<7x1xf32> to vector<7x128xf32>
    %37 = arith.addf %34, %36 : vector<7x128xf32>
    %cst_16 = arith.constant 0.000000e+00 : f32
    %38 = vector.broadcast %cst_16 : f32 to vector<7x128xf32>
    %39 = arith.maximumf %37, %38 : vector<7x128xf32>
    %c0_17 = arith.constant 0 : index
    %c0_18 = arith.constant 0 : index
    %40 = vector.load %arg6[%c0_17, %c0_18] : memref<7x7xf32, #tpu.memory_space<vmem>>, vector<7x7xf32>
    %cst_19 = arith.constant dense<0.000000e+00> : vector<7x128xf32>
    %41 = tpu.matmul %40, %39, %cst_19 {dimension_numbers = #tpu.dot_dimension_numbers<[1], [0], [0], [1], [0, 0, 1, 1], [], []>} : vector<7x7xf32>, vector<7x128xf32>, vector<7x128xf32> -> vector<7x128xf32>
    %c0_20 = arith.constant 0 : index
    %c0_21 = arith.constant 0 : index
    %42 = vector.load %arg9[%c0_20, %c0_21] : memref<7x1xf32, #tpu.memory_space<vmem>>, vector<7x1xf32>
    %43 = vector.broadcast %42 : vector<7x1xf32> to vector<7x128xf32>
    %44 = arith.addf %41, %43 : vector<7x128xf32>
    %45 = arith.addf %1, %44 : vector<7x128xf32>
    %c0_22 = arith.constant 0 : index
    %c0_23 = arith.constant 0 : index
    %c0_24 = arith.constant 0 : index
    %46 = vector.load %arg10[%c0_22, %c0_23, %c0_24] : memref<1x7x128xf32, #tpu.memory_space<vmem>>, vector<1x7x128xf32>
    %47 = vector.shape_cast %46 : vector<1x7x128xf32> to vector<7x128xf32>
    %48 = vector.shape_cast %45 : vector<7x128xf32> to vector<1x7x128xf32>
    tpu.vector_store %arg10[%c0_22, %c0_23, %c0_24], %48 {strides = array<i32>} : memref<1x7x128xf32, #tpu.memory_space<vmem>>, vector<1x7x128xf32>,
    return
  }
  func.func @transform_0(%arg0: i32, %arg1: i32) -> (i32, i32, i32) {
    %c0_i32 = arith.constant 0 : i32
    %c0_i32_0 = arith.constant 0 : i32
    return %arg0, %c0_i32, %arg1 : i32, i32, i32
  }
  func.func @transform_1(%arg0: i32, %arg1: i32) -> (i32, i32, i32) {
    %c1_i32 = arith.constant 1 : i32
    %0 = arith.muli %arg1, %c1_i32 : i32
    %c1_i32_0 = arith.constant 1 : i32
    %1 = arith.subi %0, %c1_i32_0 : i32
    %c0_i32 = arith.constant 0 : i32
    %2 = arith.maxsi %1, %c0_i32 : i32
    %c0_i32_1 = arith.constant 0 : i32
    %c0_i32_2 = arith.constant 0 : i32
    return %arg0, %c0_i32_1, %2 : i32, i32, i32
  }
  func.func @transform_2(%arg0: i32, %arg1: i32) -> (i32, i32) {
    %c0_i32 = arith.constant 0 : i32
    %c0_i32_0 = arith.constant 0 : i32
    %c0_i32_1 = arith.constant 0 : i32
    return %c0_i32, %c0_i32_0 : i32, i32
  }
  func.func @transform_3(%arg0: i32, %arg1: i32) -> (i32, i32) {
    %c0_i32 = arith.constant 0 : i32
    %c0_i32_0 = arith.constant 0 : i32
    %c0_i32_1 = arith.constant 0 : i32
    return %c0_i32, %c0_i32_0 : i32, i32
  }
  func.func @transform_4(%arg0: i32, %arg1: i32) -> (i32, i32) {
    %c0_i32 = arith.constant 0 : i32
    %c0_i32_0 = arith.constant 0 : i32
    %c0_i32_1 = arith.constant 0 : i32
    return %c0_i32, %c0_i32_0 : i32, i32
  }
  func.func @transform_5(%arg0: i32, %arg1: i32) -> (i32, i32) {
    %c0_i32 = arith.constant 0 : i32
    %c0_i32_0 = arith.constant 0 : i32
    %c0_i32_1 = arith.constant 0 : i32
    return %c0_i32, %c0_i32_0 : i32, i32
  }
  func.func @transform_6(%arg0: i32, %arg1: i32) -> (i32, i32) {
    %c0_i32 = arith.constant 0 : i32
    %c0_i32_0 = arith.constant 0 : i32
    %c0_i32_1 = arith.constant 0 : i32
    return %c0_i32, %c0_i32_0 : i32, i32
  }
  func.func @transform_7(%arg0: i32, %arg1: i32) -> (i32, i32) {
    %c0_i32 = arith.constant 0 : i32
    %c0_i32_0 = arith.constant 0 : i32
    %c0_i32_1 = arith.constant 0 : i32
    return %c0_i32, %c0_i32_0 : i32, i32
  }
  func.func @transform_8(%arg0: i32, %arg1: i32) -> (i32, i32, i32) {
    %c0_i32 = arith.constant 0 : i32
    %c0_i32_0 = arith.constant 0 : i32
    return %arg0, %c0_i32, %arg1 : i32, i32, i32
  }
}

</mosaic_0001>

<bundles_post_ra>
// kernel: tpu_custom_call.1
= control target key start
LH: loop header
LB: loop body
LE: loop exit
PB: predicated region body
PF: predicated region fallthrough
CT: control target
= control target key end

     0   :  { %s1001_s27 = smov 0   ;;  %s1003_s28 = smov 0   ;;  %s1119_s0 = inlined_call_operand.vmem [shape: f32[2,7,333], index: 0, kind: input, shape index: {}]   ;;  %s1120_s1 = inlined_call_operand.vmem [shape: f32[2,7,333], index: 1, kind: input, shape index: {}]   ;;  %s1121_s2 = inlined_call_operand.vmem [shape: f32[7,35], index: 2, kind: input, shape index: {}]   ;;  %s1122_s3 = inlined_call_operand.vmem [shape: f32[7,35], index: 3, kind: input, shape index: {}]   ;;  %s1123_s4 = inlined_call_operand.vmem [shape: f32[7,7], index: 4, kind: input, shape index: {}]   ;;  %s1124_s5 = inlined_call_operand.vmem [shape: f32[7,1], index: 5, kind: input, shape index: {}]   ;;  %s1125_s6 = inlined_call_operand.vmem [shape: f32[7,1], index: 6, kind: input, shape index: {}]   ;;  %s1126_s7 = inlined_call_operand.vmem [shape: f32[7,1], index: 7, kind: input, shape index: {}]   ;;  %s1127_s8 = inlined_call_operand.vmem [shape: f32[2,7,333], index: 8, kind: output, shape index: {}]  }
   0x1   :  { %s1005_s29 = smov 0   ;;  %s1007_s30 = smov 0  }
   0x2   :  { %s1009_s9 = smov 0  }
   0x3 LB: > { %s27_s10 = sadd.s32 1, %s936_s29  ;;  %s30_s11 = sadd.s32 1, %s940_s30  ;;  %s944_s9 = sphi %s1009_s9, %s18_s9   ;;  %s940_s30 = sphi %s1007_s30, %s1131_s30   ;;  %s936_s29 = sphi %s1005_s29, %s1130_s29   ;;  %s932_s28 = sphi %s1003_s28, %s1129_s28   ;;  %s928_s27 = sphi %s1001_s27, %s1128_s27  }
   0x4   : > { %p28_p0 = scmp.ge.s32.totalorder %s27_s10, 3  ;;  %p780_p1 = scmp.ge.s32.totalorder %s944_s9, 1 }
   0x5   : > { %p308_p2 = scmp.lt.s32.totalorder %s944_s9, 7 }
   0x6   : > { %s1133_s10 = smov (%p28_p0, %s27_s10), 0  ;;  %s1135_s11 = smov (!%p28_p0, %s30_s11), %s940_s30 }
   0x7   : > { %p309_p3 = pnand %p780_p1, %p308_p2  ;;  %p32_p4 = scmp.ge.s32.totalorder %s1135_s11, 2 }
   0x8   : > { %p359_p5 = scmp.lt.s32.totalorder (!%p309_p3), %s932_s28, 1  ;;  %p361_p6 = scmp.lt.s32.totalorder (!%p309_p3), %s928_s27, 2 }
   0x9   : > { %s1137_s11 = smov (%p32_p4, %s1135_s11), 0  ;;  %312 = sbr.rel (%p309_p3) target bundleno = 817 (0x331), region = 52 }
   0xa   : > { %s782_s12 = sadd.s32 (!%p309_p3), 4294967295, %s928_s27  ;;  %p390_p7 = scmp.gt.s32.totalorder (!%p309_p3), %s928_s27, 0 }
   0xb   : > { %p368_p8 = scmp.gt.s32.totalorder (!%p309_p3), %s782_s12, 0  ;;  %p783_p9 = scmp.lt.s32.totalorder (!%p309_p3), %s782_s12, 2 }
   0xc   : > { %s946_s26 = smov (!%p309_p3), 124   ;;  %s794_s21 = sshll.u32 (!%p309_p3), %s928_s27, 7 }
   0xd   : > { %s954_s23 = smov (!%p309_p3), 123  }
   0xe   : > { %s1139_s28 = smov (!%p359_p5, %s932_s28), 1  ;;  %s1141_s12 = smov (!%p368_p8, %s782_s12), 0  ;;  %vm447_vm1 = vcmask 1043456   ;;  %vm424_vm2 = vcmask 1022976   ;;  %vm434_vm3 = vcmask 1014784   ;;  %vm404_vm4 = vcmask 1039360  }
   0xf   : > { %s362_s13 = scalar_select %p361_p6, %s928_s27, 2  ;;  %vm414_vm5 = vcmask 1031168   ;;  %vm444_vm6 = vcmask 1044480   ;;  %vm441_vm7 = vcmask 1045504   ;;  %vm438_vm8 = vcmask 1046528  }
  0x10   : > { %s803_s14 = smul.u32 3, %s1139_s28  ;;  %s1143_s12 = smov (!%p783_p9, %s1141_s12), 2  ;;  %v451_v42 = vld [vmem:[%s1124_s5] sm:$0x7f]  ;;  %v951_v43 = vmov 0   ;;  %vm503_vm9 = vcmask 1042432  }
  0x11   : > { %s392_s15 = scalar_select %p390_p7, 1, 0  ;;  %889 = vset.pattern.permute.xlu2 %v951_v43  ;;  %905 = vset.pattern.permute.xlu0 %v951_v43  ;;  %vm485_vm10 = vcmask 195584   ;;  %v450_v62 = vld [vmem:[%s1121_s2] sm:$0x7f]  ;;  %vm499_vm11 = vcmask 285696  }
  0x12   : > { %s1037_s16 = sadd.s32 %s803_s14, %s362_s13  ;;  %s375_s17 = sadd.s32 %s803_s14, %s1143_s12  ;;  %vm594_vm14 = vcmask 883712   ;;  %vm585_vm15 = vcmask 924672  }
  0x13   : > { %v393_v0 = vstv %s392_s15  ;;  %s781_s18 = sshll.u32 %s1037_s16, 3  ;;  %s788_s19 = sshll.u32 %s375_s17, 3 }
  0x14   : > { %vm394_vm0 = vcmp.eq.s32.totalorder %v393_v0, 1  ;;  %s366_s22 = scalar_lea.vmem %s1119_s0, %s781_s18  ;;  %s377_s25 = scalar_lea.vmem %s1120_s1, %s788_s19  ;;  %v548_v0 = vlaneseq }
  0x15   : > { %v1048_v1 = vld [vmem:[%s366_s22] sm:$0x7f]  ;;  %s947_s28 = smov 125   ;;  %s948_s12 = smov 127  }
  0x16   : > { %v391_v2 = vld [vmem:[%s377_s25] sm:$0x7f]  ;;  %v419_v3 = vrot.slane %v1048_v1, 3  ;;  %v399_v4 = vrot.slane %v1048_v1, 1  ;;  %v409_v12 = vrot.slane %v1048_v1, 2  ;;  %v429_v13 = vrot.slane %v1048_v1, 4 }
  0x17   : > { %v395_v5 = vsel %vm394_vm0, %v391_v2, 0.0  ;;  %s949_s13 = smov 126   ;;  %s950_s14 = smov 24   ;;  %v549_v2 = vand.u32 127, %v548_v0  ;;  %vm576_vm0 = vcmask 965632  }
  0x18   : > { %v428_v6 = vrot.slane %v395_v5, 4  ;;  %v418_v7 = vrot.slane %v395_v5, 3  ;;  %v398_v8 = vrot.slane %v395_v5, 1  ;;  %v408_v11 = vrot.slane %v395_v5, 2  ;;  %s952_s22 = smov 108   ;;  %s953_s27 = smov 113  }
  0x1a   : > { %430 = vrot.lane.b32.xlu0 %v428_v6, %s946_s26  ;;  %v854_v9 = vpack.i.bf16 %v419_v3, %v418_v7  ;;  %v864_v10 = vpack.i.bf16 %v399_v4, %v398_v8  ;;  %v859_v14 = vpack.i.bf16 %v409_v12, %v408_v11  ;;  %v550_v3 = vadd.s32 128, %v549_v2 }
  0x1b   : > { %v552_v4 = vstv %s794_s21  ;;  %s388_s21 = scalar_lea.vmem %s1127_s8, %s781_s18 }
  0x1c   : > { %855 = vrot.lane.b32.xlu1 %v854_v9, %s947_s28  ;;  %865 = vrot.lane.b32.xlu2 %v864_v10, %s948_s12  ;;  %v553_v6 = vadd.s32 %v552_v4, %v549_v2 }
  0x1e   : > { %vm555_vm13 = vcmp.ge.s32.totalorder %v553_v6, 20 }
  0x22   : > { %432 = vrot.lane.b32.xlu0 %v429_v13, %s946_s26  ;;  %s955_s26 = smov 118  }
  0x24   : > { %860 = vrot.lane.b32.xlu1 %v859_v14, %s949_s13 }
  0x76   : > { %v866_v17 = vpop.permute.xlu2 %865 }
  0x77   : > { %v868_v20 = vunpack.i.h.bf16 %v866_v17  ;;  %v867_v21 = vunpack.i.l.bf16 %v866_v17 }
  0x79   : > { %v405_v30 = vsel %vm404_vm4, %v867_v21, %v868_v20  ;;  %v440_v40 = vsel %vm438_vm8, %v1048_v1, %v868_v20 }
  0x7a   : > { %v439_v39 = vsel %vm438_vm8, %v395_v5, %v405_v30  ;;  %v554_v5 = vadd.s32 %v552_v4, %v550_v3 }
  0x7b   : > { %v884_v41 = vpack.i.bf16 %v440_v40, %v439_v39 }
  0x7c   : > { %vm556_vm12 = vcmp.ge.s32.totalorder %v554_v5, 20 }
  0x8c   : > { %v431_v15 = vpop.permute.xlu0 %430 }
  0x8e   : > { %v856_v16 = vpop.permute.xlu1 %855 }
  0x8f   : > { %v858_v18 = vunpack.i.h.bf16 %v856_v16  ;;  %v857_v19 = vunpack.i.l.bf16 %v856_v16 }
  0x91   : > { %v425_v24 = vsel %vm424_vm2, %v857_v19, %v858_v18  ;;  %vm567_vm2 = vcmask 1006592  }
  0x94   : > { %v433_v22 = vpop.permute.xlu0 %432 }
  0x95   : > { %v449_v23 = vsel %vm447_vm1, %v858_v18, %v433_v22  ;;  %483 = vrot.lane.b32.xlu0 %v433_v22, %s950_s14  ;;  %v435_v25 = vsel %vm434_vm3, %v431_v15, %v433_v22 }
  0x96   : > { %v861_v26 = vpop.permute.xlu1 %860  ;;  %v448_v27 = vsel %vm447_vm1, %v425_v24, %v435_v25  ;;  %481 = vrot.lane.b32.xlu2 %v435_v25, %s950_s14  ;;  %v602_v25 = vld [vmem:[%s1125_s6] sm:$0x7f] }
  0x97   : > { %v863_v28 = vunpack.i.h.bf16 %v861_v26  ;;  %v862_v29 = vunpack.i.l.bf16 %v861_v26  ;;  %v869_v31 = vpack.i.bf16 %v449_v23, %v448_v27 }
  0x99   : > { %v415_v32 = vsel %vm414_vm5, %v862_v29, %v863_v28  ;;  %870 = vrot.lane.b32.xlu1 %v869_v31, %s950_s14  ;;  %v446_v33 = vsel %vm444_vm6, %v863_v28, %v858_v18  ;;  %v443_v34 = vsel %vm441_vm7, %v868_v20, %v863_v28 }
  0x9a   : > { %v445_v35 = vsel %vm444_vm6, %v415_v32, %v425_v24  ;;  %v442_v36 = vsel %vm441_vm7, %v405_v30, %v415_v32 }
  0x9b   : > { %v874_v37 = vpack.i.bf16 %v446_v33, %v445_v35  ;;  %v879_v38 = vpack.i.bf16 %v443_v34, %v442_v36 }
  0x9d   : > { %880 = vrot.lane.b32.xlu0 %v879_v38, %s950_s14 }
  0x9e   : > { %875 = vrot.lane.b32.xlu2 %v874_v37, %s950_s14 }
  0xa1   : > { %885 = vrot.lane.b32.xlu1 %v884_v41, %s950_s14 }
  0xa6   : > { %454 = vperm.xlu2 %889, %v451_v42  }
  0xf0   : > { %v482_v44 = vpop.permute.xlu2 %481 }
  0xf8   : > { %v876_v47 = vpop.permute.xlu2 %875 }
  0xf9   : > { %v877_v49 = vunpack.i.l.bf16 %v876_v47  ;;  %v878_v52 = vunpack.i.h.bf16 %v876_v47 }
  0xfb   : > { %v488_v56 = vsel %vm485_vm10, %v877_v49, %v878_v52 }
 0x100   : > { %v455_v7 = vpop.permute.xlu2 %454 }
 0x107   : > { %v484_v45 = vpop.permute.xlu0 %483 }
 0x108   : > { %792 = vmatpush.msk.msra.mxu1 %vm503_vm9, %v484_v45  ;;  %v490_v46 = vsel %vm485_vm10, %v482_v44, %v484_v45  ;;  %v601_v44 = vld [vmem:[%s1122_s3] sm:$0x7f] }
 0x109   : > { %790 = vmatpush.msk.msra.mxu0 %vm503_vm9, %v490_v46  ;;  %v635_v46 = vld [vmem:[%s1126_s7] sm:$0x7f] }
 0x10b   : > { %v871_v48 = vpop.permute.xlu1 %870 }
 0x10c   : > { %v872_v50 = vunpack.i.l.bf16 %v871_v48  ;;  %v873_v51 = vunpack.i.h.bf16 %v871_v48 }
 0x10e   : > { %540 = vmatpush.msra.mxu1 %v873_v51  ;;  %v489_v53 = vsel %vm485_vm10, %v872_v50, %v873_v51  ;;  %v634_v51 = vld [vmem:[%s1123_s4] sm:$0x7f] }
 0x10f   : > { %520 = vmatpush.msra.mxu0 %v489_v53  ;;  %v881_v54 = vpop.permute.xlu0 %880 }
 0x110   : > { %541 = vmatpush.msra.mxu1 %v878_v52  ;;  %v882_v55 = vunpack.i.l.bf16 %v881_v54  ;;  %v883_v57 = vunpack.i.h.bf16 %v881_v54 }
 0x111   : > { %521 = vmatpush.msra.mxu0 %v488_v56 }
 0x112   : > { %542 = vmatpush.msra.mxu1 %v883_v57  ;;  %v487_v58 = vsel %vm485_vm10, %v882_v55, %v883_v57 }
 0x113   : > { %v886_v59 = vpop.permute.xlu1 %885  ;;  %522 = vmatpush.msra.mxu0 %v487_v58 }
 0x114   : > { %v887_v60 = vunpack.i.l.bf16 %v886_v59  ;;  %v888_v61 = vunpack.i.h.bf16 %v886_v59 }
 0x116   : > { %543 = vmatpush.msra.mxu1 %v888_v61  ;;  %v486_v63 = vsel %vm485_vm10, %v887_v60, %v888_v61 }
 0x117   : > { %523 = vmatpush.msra.mxu0 %v486_v63  ;;  %793 = vmatmul.msk.f32.vlgmr.msra.gmra.mxu1 %vm499_vm11, %v450_v62 }
 0x118   : > { %791 = vmatmul.msk.f32.vlgmr.msra.gmra.mxu0 %vm499_vm11, %v450_v62 }
 0x194   : > { %v545_v8 = vpop.f32.mrf.mxu1 }
 0x195   : > { %v546_v9 = vadd.f32 %v545_v8, %v455_v7  ;;  %v525_v10 = vpop.f32.mrf.mxu0 }
 0x196   : > { %v526_v11 = vadd.f32 %v525_v10, %v455_v7 }
 0x197   : > { %v558_v12 = vsel %vm556_vm12, %v546_v9, 0.0 }
 0x198   : > { %v557_v13 = vsel %vm555_vm13, %v526_v11, 0.0  ;;  %v589_v14 = vrot.slane %v558_v12, 4  ;;  %v580_v15 = vrot.slane %v558_v12, 3  ;;  %v562_v20 = vrot.slane %v558_v12, 1 }
 0x199   : > { %v588_v16 = vrot.slane %v557_v13, 4  ;;  %v579_v17 = vrot.slane %v557_v13, 3  ;;  %v561_v19 = vrot.slane %v557_v13, 1  ;;  %v570_v21 = vrot.slane %v557_v13, 2 }
 0x19a   : > { %592 = vrot.lane.b32.xlu1 %v589_v14, %s952_s22  ;;  %v571_v22 = vrot.slane %v558_v12, 2 }
 0x19b   : > { %590 = vrot.lane.b32.xlu0 %v588_v16, %s952_s22  ;;  %v890_v18 = vpack.i.bf16 %v580_v15, %v579_v17  ;;  %v900_v23 = vpack.i.bf16 %v562_v20, %v561_v19 }
 0x19c   : > { %v895_v24 = vpack.i.bf16 %v571_v22, %v570_v21 }
 0x19d   : > { %891 = vrot.lane.b32.xlu2 %v890_v18, %s953_s27 }
 0x1a2   : > { %901 = vrot.lane.b32.xlu1 %v900_v23, %s954_s23 }
 0x1a3   : > { %896 = vrot.lane.b32.xlu0 %v895_v24, %s955_s26 }
 0x1a5   : > { %605 = vperm.xlu2 %889, %v602_v25  }
 0x1ab   : > { %638 = vperm.xlu0 %905, %v635_v46  }
 0x1f7   : > { %v892_v26 = vpop.permute.xlu2 %891 }
 0x1f8   : > { %v894_v27 = vunpack.i.h.bf16 %v892_v26  ;;  %v893_v28 = vunpack.i.l.bf16 %v892_v26 }
 0x1fa   : > { %v586_v32 = vsel %vm585_vm15, %v893_v28, %v894_v27 }
 0x1ff   : > { %v606_v47 = vpop.permute.xlu2 %605 }
 0x20c   : > { %v593_v29 = vpop.permute.xlu1 %592 }
 0x20d   : > { %v591_v30 = vpop.permute.xlu0 %590 }
 0x20e   : > { %v595_v31 = vsel %vm594_vm14, %v591_v30, %v593_v29 }
 0x20f   : > { %795 = vmatpush.msk.msra.mxu2 %vm503_vm9, %v595_v31  ;;  %v600_v33 = vsel %vm447_vm1, %v586_v32, %v595_v31  ;;  %vm641_vm1 = vcmask 56320  }
 0x211   : > { %625 = vmatpush.msra.mxu2 %v600_v33 }
 0x214   : > { %v902_v34 = vpop.permute.xlu1 %901 }
 0x215   : > { %v904_v35 = vunpack.i.h.bf16 %v902_v34  ;;  %v903_v36 = vunpack.i.l.bf16 %v902_v34  ;;  %v897_v37 = vpop.permute.xlu0 %896 }
 0x216   : > { %v899_v38 = vunpack.i.h.bf16 %v897_v37  ;;  %v898_v39 = vunpack.i.l.bf16 %v897_v37 }
 0x217   : > { %v568_v41 = vsel %vm567_vm2, %v903_v36, %v904_v35 }
 0x218   : > { %v577_v40 = vsel %vm576_vm0, %v898_v39, %v899_v38  ;;  %v597_v45 = vsel %vm438_vm8, %v557_v13, %v568_v41 }
 0x219   : > { %v599_v42 = vsel %vm444_vm6, %v577_v40, %v586_v32  ;;  %v598_v43 = vsel %vm441_vm7, %v568_v41, %v577_v40 }
 0x21a   : > { %626 = vmatpush.msra.mxu2 %v599_v42 }
 0x21c   : > { %627 = vmatpush.msra.mxu2 %v598_v43 }
 0x21d   : > { %v639_v52 = vpop.permute.xlu0 %638 }
 0x21e   : > { %628 = vmatpush.msra.mxu2 %v597_v45 }
 0x21f   : > { %796 = vmatmul.msk.f32.vlgmr.msra.gmra.mxu2 %vm499_vm11, %v601_v44 }
 0x2a2   : > { %v630_v48 = vpop.f32.mrf.mxu2 }
 0x2a3   : > { %v631_v49 = vadd.f32 %v630_v48, %v606_v47 }
 0x2a5   : > { %v633_v50 = vmax.f32 %v631_v49, 0.0 }
 0x2a7   : > { %797 = vmatpush.msk.msra.mxu3 %vm438_vm8, %v633_v50 }
 0x2a8   : > { %798 = vmatmul.msk.f32.vlgmr.msra.gmra.mxu3 %vm641_vm1, %v634_v51 }
 0x32b   : > { %v665_v53 = vpop.f32.mrf.mxu3 }
 0x32c   : > { %v666_v54 = vadd.f32 %v665_v53, %v639_v52 }
 0x32e   : > { %v668_v55 = vadd.f32 %v666_v54, %v1048_v1 }
 0x330   : > { %669 = vst [vmem:[%s388_s21] sm:$0x7f] %v668_v55 }
 0x331 PF: > { %s18_s9 = sadd.s32 1, %s944_s9   ;;  %s1128_s27 = smov %s936_s29 }
 0x332   : > { %p15_p10 = scmp.ge.s32.totalorder %s18_s9, 8   ;;  %s1129_s28 = smov %s940_s30 }
 0x333   : > { %s1130_s29 = smov %s1133_s10  ;;  %s1131_s30 = smov %s1137_s11 }
 0x334   :  { %17 = sbr.rel (!%p15_p10) target bundleno = 3 (0x3), region = 85 }

</bundles_post_ra>
